<compile_context>
chip_gen: v5e
topology: v5e:2x2
jax: 0.10.0
libtpu: 0.0.40
codegen_flags: <defaults>
</compile_context>

<pallas_src>
import functools

import jax
import jax.numpy as jnp
from jax.experimental import pallas as pl
from jax.experimental.pallas import tpu as pltpu  # noqa: F401  (kept per template)

N_OUT = 3        # true head output width (padded to OUT_PAD lanes in-kernel)
OUT_PAD = 128    # lane-dense output store
H2_PAD = 128     # fc-mid width padded 30 -> 128 (lane-friendly, zeros exact)


def rnn_fc_kernel(x_ref, wih_t_ref, b_rnn_ref, whh_t_ref, w1_t_ref, b1_ref,
                  w2_t_ref, b2_ref, out_ref, *, batch, seq):
    """Whole forward pass in one kernel invocation (no grid, no scratch).

    x_ref:     (batch*seq, in)        rows in batch-first (b, t) order
    wih_t_ref: (in, hid_pad)          W_ih^T, zero-padded hidden columns
    b_rnn_ref: (1, hid_pad)           b_ih + b_hh, zero-padded
    whh_t_ref: (hid_pad, hid_pad)     W_hh^T, zero-padded
    w1_t_ref:  (hid_pad, H2_PAD)      fc0 weight^T, zero-padded
    b1_ref:    (1, H2_PAD)            fc0 bias, zero-padded
    w2_t_ref:  (H2_PAD, OUT_PAD)      fc2 weight^T, zero-padded
    b2_ref:    (1, OUT_PAD)           fc2 bias, zero-padded
    out_ref:   (seq*batch, OUT_PAD)   rows in time-major (t, b) order
    """
    hid = whh_t_ref.shape[0]

    # ---- Input projection for all timesteps at once (folded into the kernel:
    # no extra XLA launch, no x_proj HBM round trip).  Rows are (b, t) ordered.
    xp = (jnp.dot(x_ref[...], wih_t_ref[...],
                  preferred_element_type=jnp.float32)
          + b_rnn_ref[...])                               # (batch*seq, hid)
    xp = xp.reshape(batch, seq, hid)

    whh_t = whh_t_ref[...]                                # loaded once

    # ---- Serial recurrence, fully unrolled (seq is small & static).
    # t = 0: h_{-1} = 0  =>  h_0 = tanh(xp_0); skip the zero matmul.
    h = jnp.tanh(xp[:, 0, :])                             # (batch, hid)
    hs = [h]
    for t in range(1, seq):
        h = jnp.tanh(
            xp[:, t, :]
            + jnp.dot(h, whh_t, preferred_element_type=jnp.float32))
        hs.append(h)

    # ---- FC head applied once to all hidden states (registers only: no VMEM
    # scratch, no masked per-step stores, no store->load barrier).
    hs_all = jnp.concatenate(hs, axis=0)                  # (seq*batch, hid), (t,b) rows
    z = jnp.maximum(
        jnp.dot(hs_all, w1_t_ref[...], preferred_element_type=jnp.float32)
        + b1_ref[...],
        0.0)
    out_ref[...] = (
        jnp.dot(z, w2_t_ref[...], preferred_element_type=jnp.float32)
        + b2_ref[...])                                    # lane-dense store


def init_params(key, input_size=2, hidden_size=60):
    """Raw parameters mirroring the PyTorch module's shapes/init."""
    h2 = hidden_size // 2
    ks = jax.random.split(key, 8)

    def xavier(k, shape):
        fan_out, fan_in = shape
        bound = jnp.sqrt(6.0 / (fan_in + fan_out))
        return jax.random.uniform(k, shape, jnp.float32, -bound, bound)

    def torch_default(k, shape, fan_in):
        bound = 1.0 / jnp.sqrt(float(fan_in))
        return jax.random.uniform(k, shape, jnp.float32, -bound, bound)

    return dict(
        w_ih=xavier(ks[0], (hidden_size, input_size)),
        w_hh=xavier(ks[1], (hidden_size, hidden_size)),
        b_ih=torch_default(ks[2], (hidden_size,), hidden_size),
        b_hh=torch_default(ks[3], (hidden_size,), hidden_size),
        w1=torch_default(ks[4], (h2, hidden_size), hidden_size),
        b1=torch_default(ks[5], (h2,), hidden_size),
        w2=torch_default(ks[6], (N_OUT, h2), h2),
        b2=torch_default(ks[7], (N_OUT,), h2),
    )


def prepare_params(params):
    """ONE-TIME layout prep: transposes, bias fusion, exact zero padding.

    Keeps the per-call jitted forward free of parameter-side XLA fusions.
    """
    hidden, in_sz = params["w_ih"].shape
    h2 = params["w1"].shape[0]
    hid_pad = ((hidden + 7) // 8) * 8          # 60 -> 64 (sublane alignment)
    f32 = jnp.float32

    wih_t = jnp.zeros((in_sz, hid_pad), f32).at[:, :hidden].set(
        params["w_ih"].T.astype(f32))
    b_rnn = jnp.zeros((1, hid_pad), f32).at[:, :hidden].set(
        (params["b_ih"] + params["b_hh"]).astype(f32))
    whh_t = jnp.zeros((hid_pad, hid_pad), f32).at[:hidden, :hidden].set(
        params["w_hh"].T.astype(f32))
    w1_t = jnp.zeros((hid_pad, H2_PAD), f32).at[:hidden, :h2].set(
        params["w1"].T.astype(f32))
    b1 = jnp.zeros((1, H2_PAD), f32).at[:, :h2].set(params["b1"].astype(f32))
    w2_t = jnp.zeros((H2_PAD, OUT_PAD), f32).at[:h2, :N_OUT].set(
        params["w2"].T.astype(f32))
    b2 = jnp.zeros((1, OUT_PAD), f32).at[:, :N_OUT].set(params["b2"].astype(f32))

    prep = dict(wih_t=wih_t, b_rnn=b_rnn, whh_t=whh_t, w1_t=w1_t, b1=b1,
                w2_t=w2_t, b2=b2)
    return jax.tree_util.tree_map(jnp.asarray, prep)


@jax.jit
def simple_rnn_forward(x, prep):
    """x: (batch, seq, input_size) batch-first, as in the PyTorch module.

    Returns (batch, seq, 3) float32, matching `self.fc(self.rnn(x)[0])`.
    """
    x = x.astype(jnp.float32)
    batch, seq, in_sz = x.shape
    hid_pad = prep["whh_t"].shape[0]

    # Contiguous reshape: free bitcast, no extra dispatch.  Rows are (b, t).
    x2d = x.reshape(batch * seq, in_sz)

    rows = batch * seq
    flops = (2 * rows * in_sz * hid_pad                 # input projection
             + 2 * (seq - 1) * batch * hid_pad * hid_pad  # recurrence
             + 2 * rows * hid_pad * H2_PAD                 # fc0
             + 2 * rows * H2_PAD * OUT_PAD)                # fc2
    bytes_accessed = 4 * (x2d.size
                          + sum(int(p.size) for p in prep.values())
                          + rows * OUT_PAD)

    out_padded = pl.pallas_call(
        functools.partial(rnn_fc_kernel, batch=batch, seq=seq),
        out_shape=jax.ShapeDtypeStruct((rows, OUT_PAD), jnp.float32),
        cost_estimate=pl.CostEstimate(
            flops=int(flops),
            transcendentals=int(rows * hid_pad),
            bytes_accessed=int(bytes_accessed)),
    )(x2d, prep["wih_t"], prep["b_rnn"], prep["whh_t"], prep["w1_t"],
      prep["b1"], prep["w2_t"], prep["b2"])

    # (seq*batch, 128) -> (seq, batch, 128) is a free bitcast; slice + transpose
    # back to batch-first fuse into one trivial XLA copy at these shapes.
    out_tm = out_padded.reshape(seq, batch, OUT_PAD)[:, :, :N_OUT]
    return jnp.transpose(out_tm, (1, 0, 2))


def _reference_forward(x, params):
    """Pure-JAX reference (HIGHEST precision) of the PyTorch forward."""
    hp = jax.lax.Precision.HIGHEST
    x = x.astype(jnp.float32)
    batch, seq, _ = x.shape
    hidden = params["w_hh"].shape[0]
    h = jnp.zeros((batch, hidden), jnp.float32)
    hs = []
    for t in range(seq):
        h = jnp.tanh(jnp.dot(x[:, t, :], params["w_ih"].T, precision=hp)
                     + params["b_ih"]
                     + jnp.dot(h, params["w_hh"].T, precision=hp)
                     + params["b_hh"])
        hs.append(h)
    hs = jnp.stack(hs, axis=1)                                 # (batch, seq, hidden)
    z = jnp.maximum(
        jnp.einsum("bsh,oh->bso", hs, params["w1"], precision=hp) + params["b1"],
        0.0)
    return jnp.einsum("bsk,ok->bso", z, params["w2"], precision=hp) + params["b2"]


if __name__ == "__main__":
    key = jax.random.PRNGKey(0)
    pkey, xkey = jax.random.split(key)

    batch, seq, input_size, hidden_size = 2, 8, 2, 60
    params = init_params(pkey, input_size=input_size, hidden_size=hidden_size)
    prep = prepare_params(params)
    x = jax.random.normal(xkey, (batch, seq, input_size), dtype=jnp.float32)

    out = simple_rnn_forward(x, prep)
    jax.block_until_ready(out)

    assert out.shape == (batch, seq, N_OUT), out.shape
    assert bool(jnp.all(jnp.isfinite(out)))

    ref = _reference_forward(x, params)
    max_err = float(jnp.max(jnp.abs(out - ref)))
    assert max_err < 2e-3, f"max abs error vs reference: {max_err}"

    print("KERNEL_OK")
</pallas_src>

<mosaic_0001>
module attributes {stable_mosaic.version = 11 : i64} {
  func.func @rnn_fc_kernel(%arg0: memref<16x2xf32, #tpu.memory_space<vmem>>, %arg1: memref<2x64xf32, #tpu.memory_space<vmem>>, %arg2: memref<1x64xf32, #tpu.memory_space<vmem>>, %arg3: memref<64x64xf32, #tpu.memory_space<vmem>>, %arg4: memref<64x128xf32, #tpu.memory_space<vmem>>, %arg5: memref<1x128xf32, #tpu.memory_space<vmem>>, %arg6: memref<128x128xf32, #tpu.memory_space<vmem>>, %arg7: memref<1x128xf32, #tpu.memory_space<vmem>>, %arg8: memref<16x128xf32, #tpu.memory_space<vmem>>) attributes {dimension_semantics = [], scalar_prefetch = 0 : i64, scratch_operands = 0 : i64, tpu.core_type = #tpu.core_type<tc>} {
    %c0 = arith.constant 0 : index
    %c0_0 = arith.constant 0 : index
    %0 = vector.load %arg0[%c0, %c0_0] : memref<16x2xf32, #tpu.memory_space<vmem>>, vector<16x2xf32>
    %c0_1 = arith.constant 0 : index
    %c0_2 = arith.constant 0 : index
    %1 = vector.load %arg1[%c0_1, %c0_2] : memref<2x64xf32, #tpu.memory_space<vmem>>, vector<2x64xf32>
    %cst = arith.constant dense<0.000000e+00> : vector<16x64xf32>
    %2 = tpu.matmul %0, %1, %cst {dimension_numbers = #tpu.dot_dimension_numbers<[1], [0], [0], [1], [0, 0, 1, 1], [], []>} : vector<16x2xf32>, vector<2x64xf32>, vector<16x64xf32> -> vector<16x64xf32>
    %c0_3 = arith.constant 0 : index
    %c0_4 = arith.constant 0 : index
    %3 = vector.load %arg2[%c0_3, %c0_4] : memref<1x64xf32, #tpu.memory_space<vmem>>, vector<1x64xf32>
    %4 = vector.broadcast %3 : vector<1x64xf32> to vector<16x64xf32>
    %5 = arith.addf %2, %4 : vector<16x64xf32>
    %6 = vector.shape_cast %5 : vector<16x64xf32> to vector<2x8x64xf32>
    %c0_5 = arith.constant 0 : index
    %c0_6 = arith.constant 0 : index
    %7 = vector.load %arg3[%c0_5, %c0_6] : memref<64x64xf32, #tpu.memory_space<vmem>>, vector<64x64xf32>
    %8 = vector.extract_strided_slice %6 {offsets = [0, 0, 0], sizes = [2, 1, 64], strides = [1, 1, 1]} : vector<2x8x64xf32> to vector<2x1x64xf32>
    %9 = vector.shape_cast %8 : vector<2x1x64xf32> to vector<2x64xf32>
    %10 = math.tanh %9 : vector<2x64xf32>
    %11 = vector.extract_strided_slice %6 {offsets = [0, 1, 0], sizes = [2, 1, 64], strides = [1, 1, 1]} : vector<2x8x64xf32> to vector<2x1x64xf32>
    %12 = vector.shape_cast %11 : vector<2x1x64xf32> to vector<2x64xf32>
    %cst_7 = arith.constant dense<0.000000e+00> : vector<2x64xf32>
    %13 = tpu.matmul %10, %7, %cst_7 {dimension_numbers = #tpu.dot_dimension_numbers<[1], [0], [0], [1], [0, 0, 1, 1], [], []>} : vector<2x64xf32>, vector<64x64xf32>, vector<2x64xf32> -> vector<2x64xf32>
    %14 = arith.addf %12, %13 : vector<2x64xf32>
    %15 = math.tanh %14 : vector<2x64xf32>
    %16 = vector.extract_strided_slice %6 {offsets = [0, 2, 0], sizes = [2, 1, 64], strides = [1, 1, 1]} : vector<2x8x64xf32> to vector<2x1x64xf32>
    %17 = vector.shape_cast %16 : vector<2x1x64xf32> to vector<2x64xf32>
    %cst_8 = arith.constant dense<0.000000e+00> : vector<2x64xf32>
    %18 = tpu.matmul %15, %7, %cst_8 {dimension_numbers = #tpu.dot_dimension_numbers<[1], [0], [0], [1], [0, 0, 1, 1], [], []>} : vector<2x64xf32>, vector<64x64xf32>, vector<2x64xf32> -> vector<2x64xf32>
    %19 = arith.addf %17, %18 : vector<2x64xf32>
    %20 = math.tanh %19 : vector<2x64xf32>
    %21 = vector.extract_strided_slice %6 {offsets = [0, 3, 0], sizes = [2, 1, 64], strides = [1, 1, 1]} : vector<2x8x64xf32> to vector<2x1x64xf32>
    %22 = vector.shape_cast %21 : vector<2x1x64xf32> to vector<2x64xf32>
    %cst_9 = arith.constant dense<0.000000e+00> : vector<2x64xf32>
    %23 = tpu.matmul %20, %7, %cst_9 {dimension_numbers = #tpu.dot_dimension_numbers<[1], [0], [0], [1], [0, 0, 1, 1], [], []>} : vector<2x64xf32>, vector<64x64xf32>, vector<2x64xf32> -> vector<2x64xf32>
    %24 = arith.addf %22, %23 : vector<2x64xf32>
    %25 = math.tanh %24 : vector<2x64xf32>
    %26 = vector.extract_strided_slice %6 {offsets = [0, 4, 0], sizes = [2, 1, 64], strides = [1, 1, 1]} : vector<2x8x64xf32> to vector<2x1x64xf32>
    %27 = vector.shape_cast %26 : vector<2x1x64xf32> to vector<2x64xf32>
    %cst_10 = arith.constant dense<0.000000e+00> : vector<2x64xf32>
    %28 = tpu.matmul %25, %7, %cst_10 {dimension_numbers = #tpu.dot_dimension_numbers<[1], [0], [0], [1], [0, 0, 1, 1], [], []>} : vector<2x64xf32>, vector<64x64xf32>, vector<2x64xf32> -> vector<2x64xf32>
    %29 = arith.addf %27, %28 : vector<2x64xf32>
    %30 = math.tanh %29 : vector<2x64xf32>
    %31 = vector.extract_strided_slice %6 {offsets = [0, 5, 0], sizes = [2, 1, 64], strides = [1, 1, 1]} : vector<2x8x64xf32> to vector<2x1x64xf32>
    %32 = vector.shape_cast %31 : vector<2x1x64xf32> to vector<2x64xf32>
    %cst_11 = arith.constant dense<0.000000e+00> : vector<2x64xf32>
    %33 = tpu.matmul %30, %7, %cst_11 {dimension_numbers = #tpu.dot_dimension_numbers<[1], [0], [0], [1], [0, 0, 1, 1], [], []>} : vector<2x64xf32>, vector<64x64xf32>, vector<2x64xf32> -> vector<2x64xf32>
    %34 = arith.addf %32, %33 : vector<2x64xf32>
    %35 = math.tanh %34 : vector<2x64xf32>
    %36 = vector.extract_strided_slice %6 {offsets = [0, 6, 0], sizes = [2, 1, 64], strides = [1, 1, 1]} : vector<2x8x64xf32> to vector<2x1x64xf32>
    %37 = vector.shape_cast %36 : vector<2x1x64xf32> to vector<2x64xf32>
    %cst_12 = arith.constant dense<0.000000e+00> : vector<2x64xf32>
    %38 = tpu.matmul %35, %7, %cst_12 {dimension_numbers = #tpu.dot_dimension_numbers<[1], [0], [0], [1], [0, 0, 1, 1], [], []>} : vector<2x64xf32>, vector<64x64xf32>, vector<2x64xf32> -> vector<2x64xf32>
    %39 = arith.addf %37, %38 : vector<2x64xf32>
    %40 = math.tanh %39 : vector<2x64xf32>
    %41 = vector.extract_strided_slice %6 {offsets = [0, 7, 0], sizes = [2, 1, 64], strides = [1, 1, 1]} : vector<2x8x64xf32> to vector<2x1x64xf32>
    %42 = vector.shape_cast %41 : vector<2x1x64xf32> to vector<2x64xf32>
    %cst_13 = arith.constant dense<0.000000e+00> : vector<2x64xf32>
    %43 = tpu.matmul %40, %7, %cst_13 {dimension_numbers = #tpu.dot_dimension_numbers<[1], [0], [0], [1], [0, 0, 1, 1], [], []>} : vector<2x64xf32>, vector<64x64xf32>, vector<2x64xf32> -> vector<2x64xf32>
    %44 = arith.addf %42, %43 : vector<2x64xf32>
    %45 = math.tanh %44 : vector<2x64xf32>
    %46 = tpu.concatenate %10, %15, %20, %25, %30, %35, %40, %45 in 0 : vector<2x64xf32>, vector<2x64xf32>, vector<2x64xf32>, vector<2x64xf32>, vector<2x64xf32>, vector<2x64xf32>, vector<2x64xf32>, vector<2x64xf32> -> vector<16x64xf32>
    %c0_14 = arith.constant 0 : index
    %c0_15 = arith.constant 0 : index
    %47 = vector.load %arg4[%c0_14, %c0_15] : memref<64x128xf32, #tpu.memory_space<vmem>>, vector<64x128xf32>
    %cst_16 = arith.constant dense<0.000000e+00> : vector<16x128xf32>
    %48 = tpu.matmul %46, %47, %cst_16 {dimension_numbers = #tpu.dot_dimension_numbers<[1], [0], [0], [1], [0, 0, 1, 1], [], []>} : vector<16x64xf32>, vector<64x128xf32>, vector<16x128xf32> -> vector<16x128xf32>
    %c0_17 = arith.constant 0 : index
    %c0_18 = arith.constant 0 : index
    %49 = vector.load %arg5[%c0_17, %c0_18] : memref<1x128xf32, #tpu.memory_space<vmem>>, vector<1x128xf32>
    %50 = vector.broadcast %49 : vector<1x128xf32> to vector<16x128xf32>
    %51 = arith.addf %48, %50 : vector<16x128xf32>
    %cst_19 = arith.constant 0.000000e+00 : f32
    %52 = vector.broadcast %cst_19 : f32 to vector<16x128xf32>
    %53 = arith.maximumf %51, %52 : vector<16x128xf32>
    %c0_20 = arith.constant 0 : index
    %c0_21 = arith.constant 0 : index
    %54 = vector.load %arg6[%c0_20, %c0_21] : memref<128x128xf32, #tpu.memory_space<vmem>>, vector<128x128xf32>
    %cst_22 = arith.constant dense<0.000000e+00> : vector<16x128xf32>
    %55 = tpu.matmul %53, %54, %cst_22 {dimension_numbers = #tpu.dot_dimension_numbers<[1], [0], [0], [1], [0, 0, 1, 1], [], []>} : vector<16x128xf32>, vector<128x128xf32>, vector<16x128xf32> -> vector<16x128xf32>
    %c0_23 = arith.constant 0 : index
    %c0_24 = arith.constant 0 : index
    %56 = vector.load %arg7[%c0_23, %c0_24] : memref<1x128xf32, #tpu.memory_space<vmem>>, vector<1x128xf32>
    %57 = vector.broadcast %56 : vector<1x128xf32> to vector<16x128xf32>
    %58 = arith.addf %55, %57 : vector<16x128xf32>
    %c0_25 = arith.constant 0 : index
    %c0_26 = arith.constant 0 : index
    %59 = vector.load %arg8[%c0_25, %c0_26] : memref<16x128xf32, #tpu.memory_space<vmem>>, vector<16x128xf32>
    tpu.vector_store %arg8[%c0_25, %c0_26], %58 {strides = array<i32>} : memref<16x128xf32, #tpu.memory_space<vmem>>, vector<16x128xf32>,
    return
  }
}

</mosaic_0001>

<bundles_post_ra>
// kernel: simple_rnn_forward.1
= control target key start
LH: loop header
LB: loop body
LE: loop exit
PB: predicated region body
PF: predicated region fallthrough
CT: control target
= control target key end

     0   :  { %13 = vsyncpa [#allocation3], 0  ;;  %s846_s0 = inlined_call_operand.vmem [shape: f32[16,2], index: 0, kind: input, shape index: {}]   ;;  %s847_s1 = inlined_call_operand.vmem [shape: f32[2,64], index: 1, kind: input, shape index: {}]   ;;  %s848_s2 = inlined_call_operand.vmem [shape: f32[1,64], index: 2, kind: input, shape index: {}]   ;;  %s849_s3 = inlined_call_operand.hbm [shape: f32[64,64], index: 3, kind: input, shape index: {}]   ;;  %s850_s4 = inlined_call_operand.hbm [shape: f32[64,128], index: 4, kind: input, shape index: {}]   ;;  %s851_s5 = inlined_call_operand.vmem [shape: f32[1,128], index: 5, kind: input, shape index: {}]   ;;  %s852_s6 = inlined_call_operand.hbm [shape: f32[128,128], index: 6, kind: input, shape index: {}]   ;;  %s853_s7 = inlined_call_operand.vmem [shape: f32[1,128], index: 7, kind: input, shape index: {}]   ;;  %s854_s8 = inlined_call_operand.vmem [shape: f32[16,128], index: 8, kind: output, shape index: {}]  }
   0x1   :  { %14 = vsyncpa [#allocation5], 0  ;;  %s38_s29 = sshll.u32 %s850_s4, 4  ;;  %s638_s30 = smov [#allocation4]   ;;  %s39_s29 = int_to_ptr.hbm [resolvable:$true] %s38_s29 }
   0x2   :  { %s40_s9 = sshll.u32 %s638_s30, 4  ;;  %s25_s12 = sshll.u32 %s849_s3, 4  ;;  %s41_s9 = int_to_ptr.vmem [resolvable:$true] %s40_s9  ;;  %s26_s12 = int_to_ptr.hbm [resolvable:$true] %s25_s12 }
   0x3   :  { %s639_s13 = smov 128   ;;  %s640_s14 = smov 8  }
   0x4   :  { %46 = dma.hbm_to_vmem [thread:$0]  %s39_s29, 1024, %s41_s9, [#allocation5], %s639_s13, %s639_s13, %s640_s14  }
   0x5   :  { %s641_s15 = smov [#allocation2]   ;;  %s53_s19 = sshll.u32 %s852_s6, 4  ;;  %s54_s19 = int_to_ptr.hbm [resolvable:$true] %s53_s19 }
   0x6   :  { %s27_s16 = sshll.u32 %s641_s15, 4  ;;  %s642_s4 = smov [#allocation6]   ;;  %s28_s16 = int_to_ptr.vmem [resolvable:$true] %s27_s16 }
   0x7   :  { %33 = dma.hbm_to_vmem [thread:$0]  %s26_s12, 1024, %s28_s16, [#allocation3], %s639_s13, %s639_s13, %s640_s14  }
   0x8   :  { %s55_s20 = sshll.u32 %s642_s4, 4  ;;  %s56_s20 = int_to_ptr.vmem [resolvable:$true] %s55_s20 }
   0x9   :  { %61 = dma.hbm_to_vmem [thread:$0]  %s54_s19, 2048, %s56_s20, [#allocation5], %s639_s13, %s639_s13, %s640_s14  }
   0xa   :  { %634 = dma.done.wait [#allocation3], 1024  }
   0xb   :  { %635 = vsyncadd [#allocation3], 4294966272 }
   0xc   :  { %636 = dma.done.wait [#allocation5], 3072  }
   0xd   :  { %637 = vsyncadd [#allocation5], 4294964224  ;;  %vm90_vm0 = vcmask 1041408   ;;  %vm83_vm1 = vcmask 15360   ;;  %v78_v0 = vld [vmem:[%s847_s1] sm:$0x3] }
   0xe   :  { %v76_v1 = vld [vmem:[%s846_s0] sm:$0xff]  ;;  %510 = vmatpush.msk.msra.mxu0 %vm90_vm0, %v78_v0  ;;  %v77_v2 = vld [vmem:[%s846_s0 + $0x8] sm:$0xff]  ;;  %v707_v3 = vld [vmem:[#allocation2 + $0x38] sm:$0xff]  ;;  %vm130_vm2 = vcmask 1041409   ;;  %vm132_vm3 = vcmask 523264   ;;  %vm381_vm4 = vcmask 1043459  }
   0xf   :  { %511 = vmatmul.msk.f32.vlgmr.msra.gmra.mxu0 %vm83_vm1, %v76_v1  ;;  %143 = vmatpush.msra.mxu2 %v707_v3  ;;  %v712_v4 = vld [vmem:[#allocation2 + $0x30] sm:$0xff]  ;;  %v716_v5 = vld [vmem:[#allocation2 + $0x28] sm:$0xff]  ;;  %v718_v6 = vld [vmem:[#allocation2 + $0x20] sm:$0xff]  ;;  %vm386_vm5 = vcmask 1045509   ;;  %vm409_vm6 = vcmask 1043456   ;;  %vm391_vm7 = vcmask 1047559  }
  0x10   :  { %213 = vmatpush.msra.mxu3 %v707_v3  ;;  %249 = vmatpush.msrb.mxu0 %v707_v3  ;;  %v723_v7 = vld [vmem:[#allocation2 + $0x18] sm:$0xff]  ;;  %v728_v8 = vld [vmem:[#allocation2 + $0x10] sm:$0xff]  ;;  %v733_v9 = vld [vmem:[#allocation2 + $0x8] sm:$0xff]  ;;  %vm411_vm8 = vcmask 1045504  }
  0x11   :  { %144 = vmatpush.msra.mxu2 %v712_v4  ;;  %v738_v10 = vld [vmem:[#allocation2] sm:$0xff]  ;;  %v423_v46 = vld [vmem:[#allocation4 + $0x38] sm:$0xff]  ;;  %v422_v47 = vld [vmem:[#allocation4 + $0x30] sm:$0xff] }
  0x12   :  { %214 = vmatpush.msra.mxu3 %v712_v4  ;;  %250 = vmatpush.msrb.mxu0 %v712_v4  ;;  %v527_v12 = vld [vmem:[%s848_s2] ss:$0 sm:$0xff]  ;;  %v421_v48 = vld [vmem:[#allocation4 + $0x28] sm:$0xff]  ;;  %v419_v50 = vld [vmem:[#allocation4 + $0x18] sm:$0xff] }
  0x13   :  { %145 = vmatpush.msra.mxu2 %v716_v5  ;;  %v420_v49 = vld [vmem:[#allocation4 + $0x20] sm:$0xff]  ;;  %v418_v51 = vld [vmem:[#allocation4 + $0x10] sm:$0xff]  ;;  %v417_v52 = vld [vmem:[#allocation4 + $0x8] sm:$0xff] }
  0x14   :  { %215 = vmatpush.msra.mxu3 %v716_v5  ;;  %251 = vmatpush.msrb.mxu0 %v716_v5  ;;  %v416_v53 = vld [vmem:[#allocation4] sm:$0xff]  ;;  %v474_v54 = vld [vmem:[#allocation6 + $0x78] sm:$0xff]  ;;  %v473_v55 = vld [vmem:[#allocation6 + $0x70] sm:$0xff] }
  0x15   :  { %146 = vmatpush.msra.mxu2 %v718_v6  ;;  %479 = vmatpush.msra.mxu1 %v474_v54  ;;  %v472_v56 = vld [vmem:[#allocation6 + $0x68] sm:$0xff]  ;;  %v471_v57 = vld [vmem:[#allocation6 + $0x60] sm:$0xff]  ;;  %v470_v58 = vld [vmem:[#allocation6 + $0x58] sm:$0xff] }
  0x16   :  { %216 = vmatpush.msra.mxu3 %v718_v6  ;;  %252 = vmatpush.msrb.mxu0 %v718_v6  ;;  %v469_v60 = vld [vmem:[#allocation6 + $0x50] sm:$0xff]  ;;  %v468_v63 = vld [vmem:[#allocation6 + $0x48] sm:$0xff] }
  0x17   :  { %512 = vmatmul.msk.f32.gmra.mxu0 %vm83_vm1, %v77_v2  ;;  %147 = vmatpush.msra.mxu2 %v723_v7  ;;  %v467_v2 = vld [vmem:[#allocation6 + $0x40] sm:$0xff] }
  0x18   :  { %217 = vmatpush.msra.mxu3 %v723_v7  ;;  %253 = vmatpush.msrb.mxu0 %v723_v7 }
  0x19   :  { %148 = vmatpush.msra.mxu2 %v728_v8  ;;  %480 = vmatpush.msra.mxu1 %v473_v55 }
  0x1a   :  { %218 = vmatpush.msra.mxu3 %v728_v8  ;;  %254 = vmatpush.msrb.mxu0 %v728_v8 }
  0x1b   :  { %149 = vmatpush.msra.mxu2 %v733_v9  ;;  %481 = vmatpush.msra.mxu1 %v472_v56 }
  0x1c   :  { %219 = vmatpush.msra.mxu3 %v733_v9  ;;  %255 = vmatpush.msrb.mxu0 %v733_v9 }
  0x1d   :  { %150 = vmatpush.msra.mxu2 %v738_v10  ;;  %482 = vmatpush.msra.mxu1 %v471_v57 }
  0x1e   :  { %220 = vmatpush.msra.mxu3 %v738_v10  ;;  %256 = vmatpush.msrb.mxu0 %v738_v10 }
  0x1f   :  { %177 = vmatpush.msrb.mxu2 %v707_v3  ;;  %483 = vmatpush.msra.mxu1 %v470_v58 }
  0x20   :  { %285 = vmatpush.msrb.mxu3 %v707_v3  ;;  %442 = vmatpush.msra.mxu0 %v423_v46 }
  0x21   :  { %178 = vmatpush.msrb.mxu2 %v712_v4  ;;  %484 = vmatpush.msra.mxu1 %v469_v60 }
  0x22   :  { %286 = vmatpush.msrb.mxu3 %v712_v4  ;;  %443 = vmatpush.msra.mxu0 %v422_v47 }
  0x23   :  { %179 = vmatpush.msrb.mxu2 %v716_v5  ;;  %485 = vmatpush.msra.mxu1 %v468_v63 }
  0x24   :  { %287 = vmatpush.msrb.mxu3 %v716_v5  ;;  %444 = vmatpush.msra.mxu0 %v421_v48 }
  0x25   :  { %180 = vmatpush.msrb.mxu2 %v718_v6  ;;  %486 = vmatpush.msra.mxu1 %v467_v2 }
  0x26   :  { %288 = vmatpush.msrb.mxu3 %v718_v6  ;;  %445 = vmatpush.msra.mxu0 %v420_v49 }
  0x27   :  { %181 = vmatpush.msrb.mxu2 %v723_v7 }
  0x28   :  { %289 = vmatpush.msrb.mxu3 %v723_v7  ;;  %446 = vmatpush.msra.mxu0 %v419_v50 }
  0x29   :  { %182 = vmatpush.msrb.mxu2 %v728_v8 }
  0x2a   :  { %290 = vmatpush.msrb.mxu3 %v728_v8  ;;  %447 = vmatpush.msra.mxu0 %v418_v51 }
  0x2b   :  { %183 = vmatpush.msrb.mxu2 %v733_v9 }
  0x2c   :  { %291 = vmatpush.msrb.mxu3 %v733_v9  ;;  %448 = vmatpush.msra.mxu0 %v417_v52 }
  0x2d   :  { %184 = vmatpush.msrb.mxu2 %v738_v10 }
  0x2e   :  { %292 = vmatpush.msrb.mxu3 %v738_v10  ;;  %449 = vmatpush.msra.mxu0 %v416_v53 }
  0x8c   :  { %v111_v11 = vpop.f32.mrf.mxu0 }
  0x8d   :  { %v766_v14 = vadd.f32 %v527_v12, %v111_v11 }
  0x94   :  { %v114_v13 = vpop.f32.mrf.mxu0 }
  0x95   :  { %v768_v15 = vadd.f32 %v527_v12, %v114_v13  ;;  %v465_v13 = vld [vmem:[#allocation6 + $0x30] sm:$0xff] }
  0x97   :  { %530 = vtanh.f32 %v768_v15 }
  0x98   :  { %532 = vtanh.f32 %v766_v14 }
  0x9d   :  { %v531_v16 = vpop.eup %530 }
  0x9e   :  { %v129_v17 = vrot.slane %v531_v16, 7  ;;  %v533_v18 = vpop.eup %532  ;;  %v464_v16 = vld [vmem:[#allocation6 + $0x28] sm:$0xff] }
  0xa0   :  { %v131_v19 = vsel %vm130_vm2, %v129_v17, %v533_v18  ;;  %v463_v17 = vld [vmem:[#allocation6 + $0x20] sm:$0xff]  ;;  %v462_v18 = vld [vmem:[#allocation6 + $0x18] sm:$0xff] }
  0xa1   :  { %513 = vmatmul.msk.f32.vlgmr.msra.gmra.mxu2 %vm132_vm3, %v131_v19 }
  0xa2   :  { %321 = vmatpush.msra.mxu2 %v707_v3 }
  0xa4   :  { %322 = vmatpush.msra.mxu2 %v712_v4 }
  0xa6   :  { %323 = vmatpush.msra.mxu2 %v716_v5 }
  0xa8   :  { %324 = vmatpush.msra.mxu2 %v718_v6 }
  0xaa   :  { %325 = vmatpush.msra.mxu2 %v723_v7 }
  0xac   :  { %326 = vmatpush.msra.mxu2 %v728_v8 }
  0xae   :  { %327 = vmatpush.msra.mxu2 %v733_v9 }
  0xb0   :  { %328 = vmatpush.msra.mxu2 %v738_v10 }
 0x124   :  { %v152_v20 = vpop.f32.mrf.mxu2 }
 0x125   :  { %v156_v21 = vrot.slane %v152_v20, 7  ;;  %v160_v22 = vadd.f32 %v152_v20, %v768_v15  ;;  %v460_v20 = vld [vmem:[#allocation6 + $0x8] sm:$0xff] }
 0x127   :  { %v159_v23 = vadd.f32 %v156_v21, %v766_v14  ;;  %534 = vtanh.f32 %v160_v22  ;;  %v459_v21 = vld [vmem:[#allocation6] sm:$0xff] }
 0x129   :  { %536 = vtanh.f32 %v159_v23 }
 0x12d   :  { %v535_v24 = vpop.eup %534 }
 0x12e   :  { %v380_v27 = vrot.slane %v535_v24, 6 }
 0x12f   :  { %v537_v25 = vpop.eup %536 }
 0x130   :  { %v379_v26 = vrot.slane %v537_v25, 7  ;;  %v165_v28 = vrot.slane %v537_v25, 1 }
 0x132   :  { %v166_v29 = vsel %vm130_vm2, %v535_v24, %v165_v28  ;;  %v382_v30 = vsel %vm381_vm4, %v380_v27, %v379_v26  ;;  %v814_v27 = vld [vmem:[%s851_s5] ss:$0 sm:$0xff] }
 0x133   :  { %514 = vmatmul.msk.f32.vlgmr.msrb.gmra.mxu2 %vm132_vm3, %v166_v29  ;;  %v408_v44 = vsel %vm90_vm0, %v131_v19, %v382_v30  ;;  %v461_v19 = vld [vmem:[#allocation6 + $0x10] sm:$0xff] }
 0x1b6   :  { %v186_v31 = vpop.f32.mrf.mxu2 }
 0x1b7   :  { %v190_v32 = vrot.slane %v186_v31, 6  ;;  %v191_v33 = vrot.slane %v186_v31, 7 }
 0x1b9   :  { %v194_v34 = vadd.f32 %v190_v32, %v766_v14  ;;  %v195_v35 = vadd.f32 %v191_v33, %v768_v15 }
 0x1bb   :  { %538 = vtanh.f32 %v194_v34 }
 0x1bc   :  { %540 = vtanh.f32 %v195_v35 }
 0x1c1   :  { %v539_v36 = vpop.eup %538 }
 0x1c2   :  { %v541_v37 = vpop.eup %540  ;;  %v384_v38 = vrot.slane %v539_v36, 6  ;;  %v200_v39 = vrot.slane %v539_v36, 2  ;;  %v529_v36 = vld [vmem:[%s853_s7] ss:$0 sm:$0xff] }
 0x1c3   :  { %v385_v40 = vrot.slane %v541_v37, 5  ;;  %v201_v41 = vrot.slane %v541_v37, 1 }
 0x1c5   :  { %v202_v42 = vsel %vm130_vm2, %v201_v41, %v200_v39  ;;  %v387_v43 = vsel %vm386_vm5, %v385_v40, %v384_v38 }
 0x1c6   :  { %515 = vmatmul.msk.f32.vlgmr.msra.gmra.mxu3 %vm132_vm3, %v202_v42  ;;  %v410_v45 = vsel %vm409_vm6, %v408_v44, %v387_v43 }
 0x1c7   :  { %357 = vmatpush.msra.mxu3 %v707_v3  ;;  %v466_v3 = vld [vmem:[#allocation6 + $0x38] sm:$0xff] }
 0x1c8   :  { %487 = vmatpush.msra.mxu1 %v466_v3 }
 0x1c9   :  { %358 = vmatpush.msra.mxu3 %v712_v4 }
 0x1ca   :  { %488 = vmatpush.msra.mxu1 %v465_v13 }
 0x1cb   :  { %359 = vmatpush.msra.mxu3 %v716_v5 }
 0x1cc   :  { %489 = vmatpush.msra.mxu1 %v464_v16 }
 0x1cd   :  { %360 = vmatpush.msra.mxu3 %v718_v6 }
 0x1ce   :  { %490 = vmatpush.msra.mxu1 %v463_v17 }
 0x1cf   :  { %361 = vmatpush.msra.mxu3 %v723_v7 }
 0x1d0   :  { %491 = vmatpush.msra.mxu1 %v462_v18 }
 0x1d1   :  { %362 = vmatpush.msra.mxu3 %v728_v8 }
 0x1d2   :  { %492 = vmatpush.msra.mxu1 %v461_v19 }
 0x1d3   :  { %363 = vmatpush.msra.mxu3 %v733_v9 }
 0x1d4   :  { %493 = vmatpush.msra.mxu1 %v460_v20 }
 0x1d5   :  { %364 = vmatpush.msra.mxu3 %v738_v10 }
 0x1d6   :  { %494 = vmatpush.msra.mxu1 %v459_v21 }
 0x249   :  { %v222_v59 = vpop.f32.mrf.mxu3 }
 0x24a   :  { %v226_v61 = vrot.slane %v222_v59, 5  ;;  %v227_v62 = vrot.slane %v222_v59, 6 }
 0x24c   :  { %v230_v0 = vadd.f32 %v226_v61, %v766_v14  ;;  %v231_v1 = vadd.f32 %v227_v62, %v768_v15 }
 0x24e   :  { %542 = vtanh.f32 %v230_v0 }
 0x24f   :  { %544 = vtanh.f32 %v231_v1 }
 0x254   :  { %v543_v4 = vpop.eup %542 }
 0x255   :  { %v545_v5 = vpop.eup %544  ;;  %v236_v6 = vrot.slane %v543_v4, 3  ;;  %v389_v9 = vrot.slane %v543_v4, 5 }
 0x256   :  { %v237_v7 = vrot.slane %v545_v5, 2  ;;  %v390_v10 = vrot.slane %v545_v5, 4 }
 0x258   :  { %v238_v8 = vsel %vm130_vm2, %v237_v7, %v236_v6  ;;  %v392_v11 = vsel %vm391_vm7, %v390_v10, %v389_v9 }
 0x259   :  { %516 = vmatmul.msk.f32.vlgmr.msrb.gmra.mxu0 %vm132_vm3, %v238_v8  ;;  %v412_v12 = vsel %vm411_vm8, %v410_v45, %v392_v11 }
 0x261   :  { %520 = vmatmul.msk.f32.vlgmr.msra.gmra.mxu0 %vm132_vm3, %v412_v12 }
 0x2d6   :  { %v258_v22 = vpop.f32.mrf.mxu0 }
 0x2d7   :  { %v262_v23 = vrot.slane %v258_v22, 4  ;;  %v263_v24 = vrot.slane %v258_v22, 5 }
 0x2d9   :  { %v266_v25 = vadd.f32 %v262_v23, %v766_v14  ;;  %v267_v26 = vadd.f32 %v263_v24, %v768_v15 }
 0x2db   :  { %546 = vtanh.f32 %v266_v25 }
 0x2dc   :  { %548 = vtanh.f32 %v267_v26 }
 0x2de   :  { %v451_v28 = vpop.f32.mrf.mxu0 }
 0x2df   :  { %v452_v29 = vadd.f32 %v814_v27, %v451_v28 }
 0x2e1   :  { %v547_v30 = vpop.eup %546  ;;  %v457_v31 = vmax.f32 %v452_v29, 0.0 }
 0x2e2   :  { %v549_v32 = vpop.eup %548  ;;  %v272_v33 = vrot.slane %v547_v30, 4 }
 0x2e3   :  { %v273_v34 = vrot.slane %v549_v32, 3  ;;  %495 = vmatmul.f32.vlgmr.msra.gmra.mxu1 %v457_v31 }
 0x2e5   :  { %v274_v35 = vsel %vm130_vm2, %v273_v34, %v272_v33 }
 0x2e6   :  { %517 = vmatmul.msk.f32.vlgmr.msrb.gmra.mxu3 %vm132_vm3, %v274_v35 }
 0x360   :  { %v496_v37 = vpop.f32.mrf.mxu1 }
 0x361   :  { %v497_v38 = vadd.f32 %v529_v36, %v496_v37 }
 0x363   :  { %502 = vst [vmem:[%s854_s8] sm:$0xff] %v497_v38 }
 0x369   :  { %v294_v39 = vpop.f32.mrf.mxu3 }
 0x36a   :  { %v298_v40 = vrot.slane %v294_v39, 3  ;;  %v299_v41 = vrot.slane %v294_v39, 4 }
 0x36c   :  { %v302_v42 = vadd.f32 %v298_v40, %v766_v14  ;;  %v303_v43 = vadd.f32 %v299_v41, %v768_v15 }
 0x36e   :  { %550 = vtanh.f32 %v302_v42 }
 0x36f   :  { %552 = vtanh.f32 %v303_v43 }
 0x374   :  { %v551_v44 = vpop.eup %550 }
 0x375   :  { %v553_v45 = vpop.eup %552  ;;  %v395_v46 = vrot.slane %v551_v44, 3  ;;  %v308_v47 = vrot.slane %v551_v44, 5 }
 0x376   :  { %v396_v48 = vrot.slane %v553_v45, 2  ;;  %v309_v49 = vrot.slane %v553_v45, 4 }
 0x378   :  { %v310_v50 = vsel %vm130_vm2, %v309_v49, %v308_v47  ;;  %v397_v51 = vsel %vm381_vm4, %v396_v48, %v395_v46 }
 0x379   :  { %518 = vmatmul.msk.f32.vlgmr.msra.gmra.mxu2 %vm132_vm3, %v310_v50  ;;  %v413_v1 = vsel %vm90_vm0, %v274_v35, %v397_v51 }
 0x3fc   :  { %v330_v52 = vpop.f32.mrf.mxu2 }
 0x3fd   :  { %v334_v53 = vrot.slane %v330_v52, 2  ;;  %v335_v54 = vrot.slane %v330_v52, 3 }
 0x3ff   :  { %v338_v55 = vadd.f32 %v334_v53, %v766_v14  ;;  %v339_v56 = vadd.f32 %v335_v54, %v768_v15 }
 0x401   :  { %554 = vtanh.f32 %v338_v55 }
 0x402   :  { %556 = vtanh.f32 %v339_v56 }
 0x407   :  { %v555_v57 = vpop.eup %554 }
 0x408   :  { %v557_v58 = vpop.eup %556  ;;  %v344_v59 = vrot.slane %v555_v57, 6  ;;  %v399_v60 = vrot.slane %v555_v57, 2 }
 0x409   :  { %v345_v61 = vrot.slane %v557_v58, 5  ;;  %v400_v62 = vrot.slane %v557_v58, 1 }
 0x40b   :  { %v346_v63 = vsel %vm130_vm2, %v345_v61, %v344_v59  ;;  %v401_v0 = vsel %vm386_vm5, %v400_v62, %v399_v60 }
 0x40c   :  { %519 = vmatmul.msk.f32.vlgmr.msra.gmra.mxu3 %vm132_vm3, %v346_v63  ;;  %v414_v2 = vsel %vm409_vm6, %v413_v1, %v401_v0 }
 0x48f   :  { %v366_v3 = vpop.f32.mrf.mxu3 }
 0x490   :  { %v370_v4 = vrot.slane %v366_v3, 1  ;;  %v371_v5 = vrot.slane %v366_v3, 2 }
 0x492   :  { %v374_v6 = vadd.f32 %v370_v4, %v766_v14  ;;  %v375_v7 = vadd.f32 %v371_v5, %v768_v15 }
 0x494   :  { %558 = vtanh.f32 %v374_v6 }
 0x495   :  { %560 = vtanh.f32 %v375_v7 }
 0x49a   :  { %v559_v8 = vpop.eup %558 }
 0x49b   :  { %v405_v9 = vrot.slane %v559_v8, 1  ;;  %v561_v10 = vpop.eup %560 }
 0x49d   :  { %v406_v11 = vsel %vm391_vm7, %v561_v10, %v405_v9 }
 0x49e   :  { %v415_v12 = vsel %vm411_vm8, %v414_v2, %v406_v11 }
 0x49f   :  { %521 = vmatmul.msk.f32.gmra.mxu0 %vm132_vm3, %v415_v12 }
 0x51c   :  { %v454_v13 = vpop.f32.mrf.mxu0 }
 0x51d   :  { %v455_v16 = vadd.f32 %v814_v27, %v454_v13 }
 0x51f   :  { %v458_v17 = vmax.f32 %v455_v16, 0.0 }
 0x521   :  { %498 = vmatmul.f32.gmra.mxu1 %v458_v17 }
 0x59e   :  { %v499_v18 = vpop.f32.mrf.mxu1 }
 0x59f   :  { %v500_v14 = vadd.f32 %v529_v36, %v499_v18 }
 0x5a1   :  { %503 = vst [vmem:[%s854_s8 + $0x8] sm:$0xff] %v500_v14 }
 0x5a2   :  { %508 = vsyncpa [#allocation3], 1 }
 0x5a3   :  { %509 = vsyncpa [#allocation5], 1 }

</bundles_post_ra>
